<compile_context>
chip_gen: v7x
topology: tpu7x:2x2x1
jax: 0.10.0
libtpu: 0.0.40
codegen_flags: <defaults>
</compile_context>

<pallas_src>
import numpy as np
import jax
import jax.numpy as jnp
from jax.experimental import pallas as pl
from jax.experimental.pallas import tpu as pltpu


def _round_up(x, m):
    return ((x + m - 1) // m) * m


def intra_agg_kernel(mask_ref, embed_ref, self_ref, f1_ref, f2_ref):
    # feats_1 = mask @ embed_matrix  (mean-aggregated neighbor features)
    # bf16 x bf16 inputs, f32 accumulation on the MXU.
    feats_1 = jnp.dot(mask_ref[...], embed_ref[...],
                      preferred_element_type=jnp.float32)
    # Two full-tile, lane-dense stores (feature dim is a multiple of 128).
    f1_ref[...] = feats_1
    f2_ref[...] = self_ref[...] - feats_1


def intra_agg_pallas(mask, embed_matrix, self_feats):
    """feats_1 = mask @ embed; returns concat([feats_1, self - feats_1], -1)."""
    B, U = mask.shape
    U2, D = embed_matrix.shape
    assert U == U2 and self_feats.shape == (B, D)

    # ---- padding for TPU-native layouts (zero padding is numerically exact)
    tb = min(256, _round_up(B, 8))        # batch tile (sublane-aligned)
    Bp = _round_up(B, tb)
    td = min(512, _round_up(D, 128))      # feature tile (lane-dense output)
    Dp = _round_up(D, td)
    Up = _round_up(U, 128)                # contraction dim -> full MXU passes

    mask_p = jnp.zeros((Bp, Up), jnp.bfloat16).at[:B, :U].set(
        mask.astype(jnp.bfloat16))
    embed_p = jnp.zeros((Up, Dp), jnp.bfloat16).at[:U, :D].set(
        embed_matrix.astype(jnp.bfloat16))
    self_p = jnp.zeros((Bp, Dp), jnp.float32).at[:B, :D].set(
        self_feats.astype(jnp.float32))

    grid = (Bp // tb, Dp // td)

    # TODO(synk): for very large U (real fraud graphs) tile the contraction dim
    # with a VMEM f32 accumulator (reduction axis last, "arbitrary"), or switch
    # to a scalar-prefetched gather/segment-mean instead of the dense mask.
    f1_p, f2_p = pl.pallas_call(
        intra_agg_kernel,
        out_shape=(jax.ShapeDtypeStruct((Bp, Dp), jnp.float32),
                   jax.ShapeDtypeStruct((Bp, Dp), jnp.float32)),
        grid_spec=pltpu.PrefetchScalarGridSpec(
            num_scalar_prefetch=0,
            grid=grid,
            in_specs=[
                pl.BlockSpec((tb, Up), lambda i, j: (i, 0)),
                pl.BlockSpec((Up, td), lambda i, j: (0, j)),
                pl.BlockSpec((tb, td), lambda i, j: (i, j)),
            ],
            out_specs=[
                pl.BlockSpec((tb, td), lambda i, j: (i, j)),
                pl.BlockSpec((tb, td), lambda i, j: (i, j)),
            ],
        ),
        compiler_params=pltpu.CompilerParams(
            dimension_semantics=("parallel", "parallel")),
    )(mask_p, embed_p, self_p)

    # Un-pad and apply the torch-style concat outside the kernel (cheap XLA
    # slice/concat; keeps the kernel stores unmasked and lane-dense).
    return jnp.concatenate([f1_p[:B, :D], f2_p[:B, :D]], axis=1)


def build_mask_and_embed(embedding_np, neighbor_lists, unique_nodes_new_index):
    """Host-side glue mirroring the PyTorch list/dict/mask construction."""
    unique_nodes_list = list(set.union(*neighbor_lists))
    unique_nodes = {n: i for i, n in enumerate(unique_nodes_list)}
    B, U = len(neighbor_lists), len(unique_nodes)

    mask = np.zeros((B, U), dtype=np.float32)
    column_indices = [unique_nodes[n] for nl in neighbor_lists for n in nl]
    row_indices = [i for i in range(B) for _ in range(len(neighbor_lists[i]))]
    mask[row_indices, column_indices] = 1.0

    num_neigh = mask.sum(axis=1, keepdims=True)
    num_neigh[num_neigh == 0] = 1.0
    mask = mask / num_neigh

    neighbors_new_index = [unique_nodes_new_index[n] for n in unique_nodes_list]
    embed_matrix = embedding_np[neighbors_new_index]  # (U, D)
    return mask, embed_matrix


if __name__ == "__main__":
    key = jax.random.PRNGKey(0)
    k_emb, k_self = jax.random.split(key)

    N_ALL = 20   # total nodes with embeddings
    B = 8        # batch nodes
    D = 32       # feature dim

    embedding = jax.random.normal(k_emb, (N_ALL, D), dtype=jnp.float32)
    self_feats = jax.random.normal(k_self, (B, D), dtype=jnp.float32)

    # deterministic neighbor structure (sets, as in the PyTorch module)
    neighbor_lists = [
        {1, 2, 3}, {2, 4}, {5}, {1, 6, 7, 8},
        {9}, {3, 10}, {11, 12}, {0, 13},
    ]
    unique_nodes_new_index = {n: n for n in range(N_ALL)}  # identity remap

    embedding_np = np.asarray(embedding)
    mask_np, embed_matrix_np = build_mask_and_embed(
        embedding_np, neighbor_lists, unique_nodes_new_index)

    mask = jnp.asarray(mask_np)
    embed_matrix = jnp.asarray(embed_matrix_np)

    out = intra_agg_pallas(mask, embed_matrix, self_feats)
    out = jax.block_until_ready(out)
    assert out.shape == (B, 2 * D)

    # Reference 1: bf16-matched (same operand precision as the MXU path).
    mask_bf = mask.astype(jnp.bfloat16).astype(jnp.float32)
    emb_bf = embed_matrix.astype(jnp.bfloat16).astype(jnp.float32)
    f1_bf = mask_bf @ emb_bf
    ref_bf = jnp.concatenate([f1_bf, self_feats - f1_bf], axis=1)
    np.testing.assert_allclose(np.asarray(out), np.asarray(ref_bf),
                               rtol=1e-5, atol=1e-5)

    # Reference 2: full f32 torch semantics (loose tol covers bf16 rounding).
    f1_ref = mask @ embed_matrix
    ref = jnp.concatenate([f1_ref, self_feats - f1_ref], axis=1)
    np.testing.assert_allclose(np.asarray(out), np.asarray(ref),
                               rtol=3e-2, atol=3e-2)

    print("KERNEL_OK")
</pallas_src>

<mosaic_0001>
module attributes {stable_mosaic.version = 11 : i64} {
  func.func @intra_agg_kernel(%arg0: i32, %arg1: i32, %arg2: memref<8x128xbf16, #tpu.memory_space<vmem>>, %arg3: memref<128x128xbf16, #tpu.memory_space<vmem>>, %arg4: memref<8x128xf32, #tpu.memory_space<vmem>>, %arg5: memref<8x128xf32, #tpu.memory_space<vmem>>, %arg6: memref<8x128xf32, #tpu.memory_space<vmem>>) attributes {dimension_semantics = [#tpu.dimension_semantics<parallel>, #tpu.dimension_semantics<parallel>], iteration_bounds = array<i64: 1, 1>, scalar_prefetch = 0 : i64, scratch_operands = 0 : i64, tpu.core_type = #tpu.core_type<tc>, window_params = [{transform_indices = @transform_0, window_bounds = array<i64: 8, 128>}, {transform_indices = @transform_1, window_bounds = array<i64: 128, 128>}, {transform_indices = @transform_2, window_bounds = array<i64: 8, 128>}, {transform_indices = @transform_3, window_bounds = array<i64: 8, 128>}, {transform_indices = @transform_4, window_bounds = array<i64: 8, 128>}]} {
    %c0 = arith.constant 0 : index
    %c0_0 = arith.constant 0 : index
    %0 = vector.load %arg2[%c0, %c0_0] : memref<8x128xbf16, #tpu.memory_space<vmem>>, vector<8x128xbf16>
    %c0_1 = arith.constant 0 : index
    %c0_2 = arith.constant 0 : index
    %1 = vector.load %arg3[%c0_1, %c0_2] : memref<128x128xbf16, #tpu.memory_space<vmem>>, vector<128x128xbf16>
    %cst = arith.constant dense<0.000000e+00> : vector<8x128xf32>
    %2 = tpu.matmul %0, %1, %cst {dimension_numbers = #tpu.dot_dimension_numbers<[1], [0], [0], [1], [0, 0, 1, 1], [], []>} : vector<8x128xbf16>, vector<128x128xbf16>, vector<8x128xf32> -> vector<8x128xf32>
    %c0_3 = arith.constant 0 : index
    %c0_4 = arith.constant 0 : index
    %3 = vector.load %arg5[%c0_3, %c0_4] : memref<8x128xf32, #tpu.memory_space<vmem>>, vector<8x128xf32>
    tpu.vector_store %arg5[%c0_3, %c0_4], %2 {strides = array<i32>} : memref<8x128xf32, #tpu.memory_space<vmem>>, vector<8x128xf32>,
    %c0_5 = arith.constant 0 : index
    %c0_6 = arith.constant 0 : index
    %4 = vector.load %arg4[%c0_5, %c0_6] : memref<8x128xf32, #tpu.memory_space<vmem>>, vector<8x128xf32>
    %5 = arith.subf %4, %2 : vector<8x128xf32>
    %c0_7 = arith.constant 0 : index
    %c0_8 = arith.constant 0 : index
    %6 = vector.load %arg6[%c0_7, %c0_8] : memref<8x128xf32, #tpu.memory_space<vmem>>, vector<8x128xf32>
    tpu.vector_store %arg6[%c0_7, %c0_8], %5 {strides = array<i32>} : memref<8x128xf32, #tpu.memory_space<vmem>>, vector<8x128xf32>,
    return
  }
  func.func @transform_0(%arg0: i32, %arg1: i32) -> (i32, i32) {
    %c0_i32 = arith.constant 0 : i32
    %c0_i32_0 = arith.constant 0 : i32
    return %arg0, %c0_i32 : i32, i32
  }
  func.func @transform_1(%arg0: i32, %arg1: i32) -> (i32, i32) {
    %c0_i32 = arith.constant 0 : i32
    %c0_i32_0 = arith.constant 0 : i32
    return %c0_i32, %arg1 : i32, i32
  }
  func.func @transform_2(%arg0: i32, %arg1: i32) -> (i32, i32) {
    %c0_i32 = arith.constant 0 : i32
    return %arg0, %arg1 : i32, i32
  }
  func.func @transform_3(%arg0: i32, %arg1: i32) -> (i32, i32) {
    %c0_i32 = arith.constant 0 : i32
    return %arg0, %arg1 : i32, i32
  }
  func.func @transform_4(%arg0: i32, %arg1: i32) -> (i32, i32) {
    %c0_i32 = arith.constant 0 : i32
    return %arg0, %arg1 : i32, i32
  }
}

</mosaic_0001>

<bundles_post_ra>
// kernel: tpu_custom_call.1
= control target key start
LH: loop header
LB: loop body
LE: loop exit
PB: predicated region body
PF: predicated region fallthrough
CT: control target
= control target key end

     0   :  { %10 = vsyncpa [#allocation3], 0  ;;  %s468_s0 = inlined_call_operand.hbm [shape: bf16[8,128], index: 0, kind: input, shape index: {}]   ;;  %s469_s1 = inlined_call_operand.hbm [shape: bf16[128,128], index: 1, kind: input, shape index: {}]   ;;  %s470_s2 = inlined_call_operand.hbm [shape: f32[8,128], index: 2, kind: input, shape index: {}]   ;;  %s471_s3 = inlined_call_operand.hbm [shape: f32[8,128], index: 3, kind: output, shape index: {0}]   ;;  %s472_s4 = inlined_call_operand.hbm [shape: f32[8,128], index: 4, kind: output, shape index: {1}]  }
   0x1   :  { %11 = vsyncpa [#allocation6], 0 }
   0x2   :  { %12 = vsyncpa [#allocation4], 0 }
   0x3   :  { %13 = vsyncpa [#allocation10], 0  ;;  %s367_s15 = smov [#allocation5]   ;;  %s249_s19 = scalar_lea.hbm %s469_s1, 1024 }
   0x4   :  { %s29_s16 = sshll.u32 %s367_s15, 4  ;;  %p250_p0 = scmp.ne.s32.totalorder %s469_s1, %s249_s19  ;;  %s30_s16 = int_to_ptr.vmem [resolvable:$true] %s29_s16 }
   0x5   :  { %p253_p1 = scmp.lt.u32.totalorder %s249_s19, %s469_s1 }
   0x7   :  { %p255_p2 = pnand %p253_p1, %p250_p0 }
   0x9   :  { %258 = shalt.err (!%p255_p2)
}
   0xa   :  { %s259_s24 = scalar_lea.vmem %s30_s16, 1024  ;;  %p264_p4 = scmp.lt.s32.totalorder %s30_s16, %s30_s16 }
   0xb   :  { %p260_p3 = scmp.ne.s32.totalorder %s30_s16, %s259_s24  ;;  %p265_p5 = scmp.lt.s32.totalorder %s259_s24, %s259_s24 }
   0xd   :  { %p266_p6 = por %p265_p5, %p264_p4 }
   0xf   :  { %p267_p7 = pnand %p266_p6, %p260_p3 }
  0x11   :  { %270 = shalt.err (!%p267_p7)
}
  0x12   :  { %s368_s25 = smov 64   ;;  %s369_s26 = smov 4  }
  0x13   :  { %35 = dma.hbm_to_vmem [thread:$0]  %s469_s1, 1024, %s30_s16, [#allocation6], %s368_s25, %s368_s25, %s369_s26  }
  0x14   :  { %s370_s29 = smov [#allocation2]   ;;  %s371_s5 = smov [#allocation7]  }
  0x15   :  { %s20_s30 = sshll.u32 %s370_s29, 4  ;;  %s42_s6 = sshll.u32 %s371_s5, 4  ;;  %s21_s30 = int_to_ptr.vmem [resolvable:$true] %s20_s30  ;;  %s43_s6 = int_to_ptr.vmem [resolvable:$true] %s42_s6 }
  0x16   :  { %s271_s9 = scalar_lea.hbm %s468_s0, 64 }
  0x17   :  { %p272_p8 = scmp.ne.s32.totalorder %s468_s0, %s271_s9  ;;  %p275_p9 = scmp.lt.u32.totalorder %s271_s9, %s468_s0 }
  0x19   :  { %p277_p10 = pnand %p275_p9, %p272_p8 }
  0x1b   :  { %280 = shalt.err (!%p277_p10)
}
  0x1c   :  { %s281_s1 = scalar_lea.vmem %s21_s30, 64  ;;  %p286_p12 = scmp.lt.s32.totalorder %s21_s30, %s21_s30 }
  0x1d   :  { %p282_p11 = scmp.ne.s32.totalorder %s21_s30, %s281_s1  ;;  %p287_p13 = scmp.lt.s32.totalorder %s281_s1, %s281_s1 }
  0x1f   :  { %p288_p0 = por %p287_p13, %p286_p12 }
  0x21   :  { %p289_p1 = pnand %p288_p0, %p282_p11 }
  0x23   :  { %292 = shalt.err (!%p289_p1)
}
  0x24   :  { %23 = dma.hbm_to_vmem [thread:$0]  %s468_s0, 64, %s21_s30, [#allocation3]  }
  0x25   :  { %s293_s18 = scalar_lea.hbm %s470_s2, 128 }
  0x26   :  { %p294_p2 = scmp.ne.s32.totalorder %s470_s2, %s293_s18  ;;  %p297_p3 = scmp.lt.u32.totalorder %s293_s18, %s470_s2 }
  0x28   :  { %p299_p4 = pnand %p297_p3, %p294_p2 }
  0x2a   :  { %302 = shalt.err (!%p299_p4)
}
  0x2b   :  { %s303_s23 = scalar_lea.vmem %s43_s6, 128  ;;  %p308_p6 = scmp.lt.s32.totalorder %s43_s6, %s43_s6 }
  0x2c   :  { %p304_p5 = scmp.ne.s32.totalorder %s43_s6, %s303_s23  ;;  %p309_p7 = scmp.lt.s32.totalorder %s303_s23, %s303_s23 }
  0x2e   :  { %p310_p8 = por %p309_p7, %p308_p6 }
  0x30   :  { %p311_p9 = pnand %p310_p8, %p304_p5 }
  0x32   :  { %314 = shalt.err (!%p311_p9)
}
  0x33   :  { %45 = dma.hbm_to_vmem [thread:$0]  %s470_s2, 128, %s43_s6, [#allocation6]  }
  0x34   :  { %359 = dma.done.wait [#allocation3], 64  }
  0x35   :  { %360 = vsyncadd [#allocation3], 4294967232 }
  0x36   :  { %361 = dma.done.wait [#allocation6], 1152  }
  0x37   :  { %362 = vsyncadd [#allocation6], 4294966144  ;;  %v372_v0 = vmov 0.0   ;;  %vm373_vm0 = vmmov 0   ;;  %v241_v1 = vld [vmem:[#allocation5] sm:$0xff]   ;;  %v242_v2 = vld [vmem:[#allocation5 + $0x8] sm:$0xff]  }
  0x38   :  { %212 = vmatprep.subr.bf16.mxu0 %v372_v0  ;;  %228 = vmatprep.mubr.msk.bf16.mxu0 %vm373_vm0, %v372_v0  ;;  %v243_v3 = vld [vmem:[#allocation5 + $0x10] sm:$0xff]   ;;  %v244_v4 = vld [vmem:[#allocation5 + $0x18] sm:$0xff]   ;;  %v245_v5 = vld [vmem:[#allocation5 + $0x20] sm:$0xff]   ;;  %s374_s2 = smov [#allocation8]   ;;  %s375_s26 = smov [#allocation9]  }
  0x39   :  { %213 = vmatpush3.bf16.msra.mxu0 %v241_v1  ;;  %v246_v6 = vld [vmem:[#allocation5 + $0x28] sm:$0xff]   ;;  %v247_v7 = vld [vmem:[#allocation5 + $0x30] sm:$0xff]   ;;  %v248_v8 = vld [vmem:[#allocation5 + $0x38] sm:$0xff]   ;;  %s171_s25 = sshll.u32 %s374_s2, 4  ;;  %s181_s27 = sshll.u32 %s375_s26, 4  ;;  %s172_s25 = int_to_ptr.vmem [resolvable:$true] %s171_s25  ;;  %s437_s27 = int_to_ptr.vmem [resolvable:$true] %s181_s27 }
  0x3a   :  { %214 = vmatprep.subr.bf16.mxu0 %v372_v0  ;;  %v56_v9 = vld [vmem:[#allocation2] sm:$0xf]  ;;  %v162_v10 = vld [vmem:[#allocation7] sm:$0xff]  ;;  %s315_s28 = scalar_lea.vmem %s172_s25, 128  ;;  %p320_p11 = scmp.lt.s32.totalorder %s172_s25, %s172_s25 }
  0x3b   :  { %p316_p10 = scmp.ne.s32.totalorder %s172_s25, %s315_s28  ;;  %p321_p12 = scmp.lt.s32.totalorder %s315_s28, %s315_s28 }
  0x3d   :  { %215 = vmatpush3.bf16.msra.mxu0 %v242_v2  ;;  %p322_p13 = por %p321_p12, %p320_p11 }
  0x3e   :  { %216 = vmatprep.subr.bf16.mxu0 %v372_v0 }
  0x3f   :  { %p323_p0 = pnand %p322_p13, %p316_p10 }
  0x41   :  { %217 = vmatpush3.bf16.msra.mxu0 %v243_v3 }
  0x42   :  { %218 = vmatprep.subr.bf16.mxu0 %v372_v0 }
  0x45   :  { %219 = vmatpush3.bf16.msra.mxu0 %v244_v4 }
  0x46   :  { %220 = vmatprep.subr.bf16.mxu0 %v372_v0 }
  0x49   :  { %221 = vmatpush3.bf16.msra.mxu0 %v245_v5 }
  0x4a   :  { %222 = vmatprep.subr.bf16.mxu0 %v372_v0 }
  0x4d   :  { %223 = vmatpush3.bf16.msra.mxu0 %v246_v6 }
  0x4e   :  { %224 = vmatprep.subr.bf16.mxu0 %v372_v0 }
  0x51   :  { %225 = vmatpush3.bf16.msra.mxu0 %v247_v7 }
  0x52   :  { %226 = vmatprep.subr.bf16.mxu0 %v372_v0 }
  0x55   :  { %227 = vmatpush3.bf16.msra.mxu0 %v248_v8 }
  0x58   :  { %229 = vmatmul.mubr.bf16.vlgmr.msra.gmra.mrb[0].mxu0 %v56_v9 }
 0x12b   :  { %v155_v11 = vpop.f32.mrb[0].mxu0 }
 0x12c   :  { %v163_v12 = vsub.f32 %v162_v10, %v155_v11  ;;  %161 = vst [vmem:[#allocation8] sm:$0xff] %v155_v11  ;;  %v230_v13 = vpop.f32.mrb[1].mxu0 }
 0x12d   :  { %v158_v14 = vpop.f32.mrb[2].mxu0 }
 0x12e   :  { %326 = shalt.err (!%p323_p0)
}
 0x12f   :  { %s327_s5 = scalar_lea.hbm %s471_s3, 128 }
 0x130   :  { %p328_p1 = scmp.ne.s32.totalorder %s471_s3, %s327_s5  ;;  %p331_p2 = scmp.lt.u32.totalorder %s327_s5, %s471_s3 }
 0x132   :  { %p333_p3 = pnand %p331_p2, %p328_p1 }
 0x134   :  { %336 = shalt.err (!%p333_p3)
}
 0x135   :  { %174 = dma.vmem_to_hbm [thread:$0]  %s172_s25, 128, %s471_s3, [#allocation4]   ;;  %164 = vst [vmem:[#allocation9] sm:$0xff] %v163_v12  ;;  %v231_v15 = vpop.f32.mrb[3].mxu0 }
 0x136   :  { %s337_s12 = scalar_lea.vmem %s437_s27, 128  ;;  %p342_p5 = scmp.lt.s32.totalorder %s437_s27, %s437_s27 }
 0x137   :  { %p338_p4 = scmp.ne.s32.totalorder %s437_s27, %s337_s12  ;;  %p343_p6 = scmp.lt.s32.totalorder %s337_s12, %s337_s12 }
 0x139   :  { %p344_p7 = por %p343_p6, %p342_p5 }
 0x13b   :  { %p345_p8 = pnand %p344_p7, %p338_p4 }
 0x13d   :  { %348 = shalt.err (!%p345_p8)
}
 0x13e   :  { %s349_s14 = scalar_lea.hbm %s472_s4, 128 }
 0x13f   :  { %p350_p9 = scmp.ne.s32.totalorder %s472_s4, %s349_s14  ;;  %p353_p10 = scmp.lt.u32.totalorder %s349_s14, %s472_s4 }
 0x141   :  { %p355_p11 = pnand %p353_p10, %p350_p9 }
 0x143   :  { %358 = shalt.err (!%p355_p11)
}
 0x144   :  { %184 = dma.vmem_to_hbm [thread:$0]  %s437_s27, 128, %s472_s4, [#allocation10]  }
 0x145   :  { %363 = dma.done.wait [#allocation4], 128  }
 0x146   :  { %364 = vsyncadd [#allocation4], 4294967168 }
 0x147   :  { %365 = dma.done.wait [#allocation10], 128  }
 0x148   :  { %366 = vsyncadd [#allocation10], 4294967168 }
 0x149   :  { %191 = vsyncpa [#allocation3], 1 }
 0x14a   :  { %192 = vsyncpa [#allocation6], 1 }
 0x14b   :  { %193 = vsyncpa [#allocation4], 1 }
 0x14c   :  { %194 = vsyncpa [#allocation10], 1 }

</bundles_post_ra>
